<compile_context>
chip_gen: v6e
topology: v6e:2x2x1
jax: 0.10.0
libtpu: 0.0.40
codegen_flags: <defaults>
</compile_context>

<pallas_src>
import math
import functools

import jax
import jax.numpy as jnp
from jax.experimental import pallas as pl
from jax.experimental.pallas import tpu as pltpu


def _round_up(x, m):
    return ((x + m - 1) // m) * m


def _supports_bf16_elementwise():
    """v6e / v7x have bf16 VPU+EUP; v5e and older do not."""
    try:
        kind = jax.devices()[0].device_kind.lower()
    except Exception:
        return False
    return ("v6" in kind) or ("v7" in kind)


def _pick_block_b(B):
    if B <= 128:
        return _round_up(B, 8)
    cap = 2048
    steps = max(2, pl.cdiv(B, cap))
    if steps % 2:           # keep step count even: both v7x TCs get work
        steps += 1
    return min(cap, _round_up(pl.cdiv(B, steps), 8))


def _actor_kernel(x_ref, w1_ref, b1_ref, w2_ref, b2_ref,
                  wm_ref, bm_ref, ws_ref, bs_ref,
                  mean_ref, std_ref,
                  *, raw_init_std, min_std, mxu_dtype, act_dtype):
    # Four matmuls (MXU, f32 accumulation) + tanh/softplus (VPU/EUP) on one
    # batch tile resident in VMEM.  Weights already arrive in mxu_dtype
    # (bf16 on the fast path); the wide tanh passes run in act_dtype
    # (bf16 on v6e/v7x, f32 on v5e); the narrow mean/std head stays f32.
    x = x_ref[...].astype(mxu_dtype)

    a1 = jnp.dot(x, w1_ref[...], preferred_element_type=jnp.float32) + b1_ref[...]
    h1 = jnp.tanh(a1.astype(act_dtype)).astype(mxu_dtype)

    a2 = jnp.dot(h1, w2_ref[...], preferred_element_type=jnp.float32) + b2_ref[...]
    h2 = jnp.tanh(a2.astype(act_dtype)).astype(mxu_dtype)

    mean = jnp.tanh(
        jnp.dot(h2, wm_ref[...], preferred_element_type=jnp.float32) + bm_ref[...])
    std = jax.nn.softplus(
        jnp.dot(h2, ws_ref[...], preferred_element_type=jnp.float32)
        + bs_ref[...] + raw_init_std) + min_std

    mean_ref[...] = mean.astype(mean_ref.dtype)
    std_ref[...] = std.astype(std_ref.dtype)


def pack_actor_params(params, *, use_bf16=True):
    """One-time parameter packing (hoisted out of the per-call hot path).

    Weights are cast to bf16 for the MXU feed (halves weight DMA/VMEM traffic);
    biases stay f32 and are added to the f32 accumulator.
    """
    w1, b1, w2, b2, wm, bm, ws, bs = params
    wt = jnp.bfloat16 if use_bf16 else jnp.float32
    return (w1.astype(wt), b1.astype(jnp.float32),
            w2.astype(wt), b2.astype(jnp.float32),
            wm.astype(wt), bm.astype(jnp.float32),
            ws.astype(wt), bs.astype(jnp.float32))


def actor_vanilla_forward(x, packed_params, *, min_std=0.1, init_std=1.0,
                          block_b=None, bf16_act=None, out_dtype=jnp.float32):
    """ActorVanilla forward. x: [B, state_dim] float32. Returns (mean, std)."""
    w1, b1, w2, b2, wm, bm, ws, bs = packed_params
    B, state_dim = x.shape
    hidden = w1.shape[1]
    action_dim = wm.shape[1]

    raw_init_std = math.log(math.exp(init_std) - 1.0)

    mxu_dtype = w1.dtype
    if bf16_act is None:
        bf16_act = _supports_bf16_elementwise()
    # bf16 elementwise only on chips with bf16 EUP/VPU, and only on the bf16
    # fast path (f32 packing => exact f32 everywhere).
    act_dtype = (jnp.bfloat16
                 if (bf16_act and mxu_dtype == jnp.bfloat16) else jnp.float32)

    if block_b is None:
        block_b = _pick_block_b(B)
    block_b = max(8, _round_up(block_b, 8))
    B_pad = _round_up(B, block_b)
    if B_pad != B:
        x = jnp.pad(x, ((0, B_pad - B), (0, 0)))

    kernel = functools.partial(
        _actor_kernel, raw_init_std=raw_init_std, min_std=min_std,
        mxu_dtype=mxu_dtype, act_dtype=act_dtype)

    grid = (B_pad // block_b,)
    const = lambda arr: pl.BlockSpec(arr.shape, lambda i: (0, 0))

    flops = 2 * B_pad * (state_dim * hidden + hidden * hidden
                         + 2 * hidden * action_dim)
    transcendentals = B_pad * (2 * hidden + 3 * action_dim)
    bytes_accessed = (
        B_pad * state_dim * x.dtype.itemsize
        + sum(int(a.size) * a.dtype.itemsize
              for a in (w1, b1, w2, b2, wm, bm, ws, bs))
        + 2 * B_pad * action_dim * jnp.dtype(out_dtype).itemsize)
    cost = pl.CostEstimate(flops=int(flops),
                           transcendentals=int(transcendentals),
                           bytes_accessed=int(bytes_accessed))

    mean, std = pl.pallas_call(
        kernel,
        out_shape=(jax.ShapeDtypeStruct((B_pad, action_dim), out_dtype),
                   jax.ShapeDtypeStruct((B_pad, action_dim), out_dtype)),
        grid=grid,
        in_specs=[
            pl.BlockSpec((block_b, state_dim), lambda i: (i, 0)),  # x tile
            const(w1), const(b1),                                  # layer 1
            const(w2), const(b2),                                  # layer 2
            const(wm), const(bm),                                  # mean head
            const(ws), const(bs),                                  # std head
        ],
        out_specs=(pl.BlockSpec((block_b, action_dim), lambda i: (i, 0)),
                   pl.BlockSpec((block_b, action_dim), lambda i: (i, 0))),
        compiler_params=pltpu.CompilerParams(
            dimension_semantics=("parallel",)),
        cost_estimate=cost,
    )(x, w1, b1, w2, b2, wm, bm, ws, bs)

    if B_pad != B:
        mean, std = mean[:B], std[:B]
    return mean, std


def _reference(x, params, min_std, init_std):
    w1, b1, w2, b2, wm, bm, ws, bs = params
    raw_init_std = math.log(math.exp(init_std) - 1.0)
    h1 = jnp.tanh(x @ w1 + b1)
    h2 = jnp.tanh(h1 @ w2 + b2)
    mean = jnp.tanh(h2 @ wm + bm)
    std = jax.nn.softplus((h2 @ ws + bs) + raw_init_std) + min_std
    return mean, std


def init_params(key, state_dim, hidden, action_dim):
    ks = jax.random.split(key, 4)

    def lin(k, fan_in, fan_out):
        bound = 1.0 / math.sqrt(fan_in)
        kw, kb = jax.random.split(k)
        w = jax.random.uniform(kw, (fan_in, fan_out), jnp.float32, -bound, bound)
        b = jax.random.uniform(kb, (1, fan_out), jnp.float32, -bound, bound)
        return w, b

    w1, b1 = lin(ks[0], state_dim, hidden)
    w2, b2 = lin(ks[1], hidden, hidden)
    wm, bm = lin(ks[2], hidden, action_dim)
    ws, bs = lin(ks[3], hidden, action_dim)
    return (w1, b1, w2, b2, wm, bm, ws, bs)


if __name__ == "__main__":
    key = jax.random.PRNGKey(0)
    k_param, k_x = jax.random.split(key)

    # Ragged batch (not a multiple of 8/128) to exercise padding + 2 grid steps.
    batch, state_dim, hidden, action_dim = 200, 32, 128, 8
    max_action = 1.0  # held by ActorVanilla; not used inside MLPBaseDist.forward
    min_std, init_std = 0.1, 1.0

    params = init_params(k_param, state_dim, hidden, action_dim)
    x = jax.random.normal(k_x, (batch, state_dim), jnp.float32)

    # decoder(x).mode() treated as identity (external module, see TODO above).
    mean_ref, std_ref = _reference(x, params, min_std, init_std)

    # Exact f32 path (f32 weights, f32 activations).
    packed_f32 = pack_actor_params(params, use_bf16=False)
    mean_f32, std_f32 = actor_vanilla_forward(
        x, packed_f32, min_std=min_std, init_std=init_std)
    mean_f32 = jax.block_until_ready(mean_f32)
    std_f32 = jax.block_until_ready(std_f32)
    assert jnp.allclose(mean_f32, mean_ref, atol=1e-5, rtol=1e-5)
    assert jnp.allclose(std_f32, std_ref, atol=1e-5, rtol=1e-5)

    # Fast path: bf16 MXU feed, bf16 activations on v6e/v7x (auto-detected).
    packed_bf16 = pack_actor_params(params, use_bf16=True)
    mean_bf, std_bf = actor_vanilla_forward(
        x, packed_bf16, min_std=min_std, init_std=init_std)
    mean_bf = jax.block_until_ready(mean_bf)
    std_bf = jax.block_until_ready(std_bf)
    assert jnp.allclose(mean_bf, mean_ref, atol=3e-2, rtol=3e-2)
    assert jnp.allclose(std_bf, std_ref, atol=3e-2, rtol=3e-2)
    assert bool(jnp.all(std_bf >= min_std))
    assert mean_bf.shape == (batch, action_dim) and std_bf.shape == (batch, action_dim)

    print("KERNEL_OK")
</pallas_src>

<mosaic_0001>
module attributes {stable_mosaic.version = 11 : i64} {
  func.func @_actor_kernel(%arg0: i32, %arg1: memref<104x32xf32, #tpu.memory_space<vmem>>, %arg2: memref<32x128xf32, #tpu.memory_space<vmem>>, %arg3: memref<1x128xf32, #tpu.memory_space<vmem>>, %arg4: memref<128x128xf32, #tpu.memory_space<vmem>>, %arg5: memref<1x128xf32, #tpu.memory_space<vmem>>, %arg6: memref<128x8xf32, #tpu.memory_space<vmem>>, %arg7: memref<1x8xf32, #tpu.memory_space<vmem>>, %arg8: memref<128x8xf32, #tpu.memory_space<vmem>>, %arg9: memref<1x8xf32, #tpu.memory_space<vmem>>, %arg10: memref<104x8xf32, #tpu.memory_space<vmem>>, %arg11: memref<104x8xf32, #tpu.memory_space<vmem>>) attributes {dimension_semantics = [#tpu.dimension_semantics<parallel>], iteration_bounds = array<i64: 2>, scalar_prefetch = 0 : i64, scratch_operands = 0 : i64, tpu.core_type = #tpu.core_type<tc>, window_params = [{transform_indices = @transform_0, window_bounds = array<i64: 104, 32>}, {pipeline_mode = #tpu.pipeline_mode<synchronous>, transform_indices = @transform_1, window_bounds = array<i64: 32, 128>}, {pipeline_mode = #tpu.pipeline_mode<synchronous>, transform_indices = @transform_2, window_bounds = array<i64: 1, 128>}, {pipeline_mode = #tpu.pipeline_mode<synchronous>, transform_indices = @transform_3, window_bounds = array<i64: 128, 128>}, {pipeline_mode = #tpu.pipeline_mode<synchronous>, transform_indices = @transform_4, window_bounds = array<i64: 1, 128>}, {pipeline_mode = #tpu.pipeline_mode<synchronous>, transform_indices = @transform_5, window_bounds = array<i64: 128, 8>}, {pipeline_mode = #tpu.pipeline_mode<synchronous>, transform_indices = @transform_6, window_bounds = array<i64: 1, 8>}, {pipeline_mode = #tpu.pipeline_mode<synchronous>, transform_indices = @transform_7, window_bounds = array<i64: 128, 8>}, {pipeline_mode = #tpu.pipeline_mode<synchronous>, transform_indices = @transform_8, window_bounds = array<i64: 1, 8>}, {transform_indices = @transform_9, window_bounds = array<i64: 104, 8>}, {transform_indices = @transform_10, window_bounds = array<i64: 104, 8>}]} {
    %c0 = arith.constant 0 : index
    %c0_0 = arith.constant 0 : index
    %0 = vector.load %arg1[%c0, %c0_0] : memref<104x32xf32, #tpu.memory_space<vmem>>, vector<104x32xf32>
    %c0_1 = arith.constant 0 : index
    %c0_2 = arith.constant 0 : index
    %1 = vector.load %arg2[%c0_1, %c0_2] : memref<32x128xf32, #tpu.memory_space<vmem>>, vector<32x128xf32>
    %cst = arith.constant dense<0.000000e+00> : vector<104x128xf32>
    %2 = tpu.matmul %0, %1, %cst {dimension_numbers = #tpu.dot_dimension_numbers<[1], [0], [0], [1], [0, 0, 1, 1], [], []>} : vector<104x32xf32>, vector<32x128xf32>, vector<104x128xf32> -> vector<104x128xf32>
    %c0_3 = arith.constant 0 : index
    %c0_4 = arith.constant 0 : index
    %3 = vector.load %arg3[%c0_3, %c0_4] : memref<1x128xf32, #tpu.memory_space<vmem>>, vector<1x128xf32>
    %4 = vector.broadcast %3 : vector<1x128xf32> to vector<104x128xf32>
    %5 = arith.addf %2, %4 : vector<104x128xf32>
    %6 = math.tanh %5 : vector<104x128xf32>
    %c0_5 = arith.constant 0 : index
    %c0_6 = arith.constant 0 : index
    %7 = vector.load %arg4[%c0_5, %c0_6] : memref<128x128xf32, #tpu.memory_space<vmem>>, vector<128x128xf32>
    %cst_7 = arith.constant dense<0.000000e+00> : vector<104x128xf32>
    %8 = tpu.matmul %6, %7, %cst_7 {dimension_numbers = #tpu.dot_dimension_numbers<[1], [0], [0], [1], [0, 0, 1, 1], [], []>} : vector<104x128xf32>, vector<128x128xf32>, vector<104x128xf32> -> vector<104x128xf32>
    %c0_8 = arith.constant 0 : index
    %c0_9 = arith.constant 0 : index
    %9 = vector.load %arg5[%c0_8, %c0_9] : memref<1x128xf32, #tpu.memory_space<vmem>>, vector<1x128xf32>
    %10 = vector.broadcast %9 : vector<1x128xf32> to vector<104x128xf32>
    %11 = arith.addf %8, %10 : vector<104x128xf32>
    %12 = math.tanh %11 : vector<104x128xf32>
    %c0_10 = arith.constant 0 : index
    %c0_11 = arith.constant 0 : index
    %13 = vector.load %arg6[%c0_10, %c0_11] : memref<128x8xf32, #tpu.memory_space<vmem>>, vector<128x8xf32>
    %cst_12 = arith.constant dense<0.000000e+00> : vector<104x8xf32>
    %14 = tpu.matmul %12, %13, %cst_12 {dimension_numbers = #tpu.dot_dimension_numbers<[1], [0], [0], [1], [0, 0, 1, 1], [], []>} : vector<104x128xf32>, vector<128x8xf32>, vector<104x8xf32> -> vector<104x8xf32>
    %c0_13 = arith.constant 0 : index
    %c0_14 = arith.constant 0 : index
    %15 = vector.load %arg7[%c0_13, %c0_14] : memref<1x8xf32, #tpu.memory_space<vmem>>, vector<1x8xf32>
    %16 = vector.broadcast %15 : vector<1x8xf32> to vector<104x8xf32>
    %17 = arith.addf %14, %16 : vector<104x8xf32>
    %18 = math.tanh %17 : vector<104x8xf32>
    %c0_15 = arith.constant 0 : index
    %c0_16 = arith.constant 0 : index
    %19 = vector.load %arg8[%c0_15, %c0_16] : memref<128x8xf32, #tpu.memory_space<vmem>>, vector<128x8xf32>
    %cst_17 = arith.constant dense<0.000000e+00> : vector<104x8xf32>
    %20 = tpu.matmul %12, %19, %cst_17 {dimension_numbers = #tpu.dot_dimension_numbers<[1], [0], [0], [1], [0, 0, 1, 1], [], []>} : vector<104x128xf32>, vector<128x8xf32>, vector<104x8xf32> -> vector<104x8xf32>
    %c0_18 = arith.constant 0 : index
    %c0_19 = arith.constant 0 : index
    %21 = vector.load %arg9[%c0_18, %c0_19] : memref<1x8xf32, #tpu.memory_space<vmem>>, vector<1x8xf32>
    %22 = vector.broadcast %21 : vector<1x8xf32> to vector<104x8xf32>
    %23 = arith.addf %20, %22 : vector<104x8xf32>
    %cst_20 = arith.constant 0.541324854 : f32
    %24 = vector.broadcast %cst_20 : f32 to vector<104x8xf32>
    %25 = arith.addf %23, %24 : vector<104x8xf32>
    %cst_21 = arith.constant 0.000000e+00 : f32
    %26 = vector.broadcast %cst_21 : f32 to vector<104x8xf32>
    %27 = arith.maximumf %25, %26 : vector<104x8xf32>
    %28 = vector.broadcast %cst_21 : f32 to vector<104x8xf32>
    %29 = arith.subf %25, %28 : vector<104x8xf32>
    %30 = arith.cmpf one, %29, %29 : vector<104x8xf32>
    %31 = vector.broadcast %cst_21 : f32 to vector<104x8xf32>
    %32 = arith.addf %25, %31 : vector<104x8xf32>
    %33 = math.absf %29 : vector<104x8xf32>
    %cst_22 = arith.constant 0.000000e+00 : f32
    %34 = vector.broadcast %cst_22 : f32 to vector<104x8xf32>
    %35 = arith.subf %34, %33 : vector<104x8xf32>
    %36 = math.exp %35 : vector<104x8xf32>
    %37 = math.log1p %36 : vector<104x8xf32>
    %38 = arith.addf %27, %37 : vector<104x8xf32>
    %39 = arith.select %30, %32, %38 : vector<104x8xi1>, vector<104x8xf32>
    %cst_23 = arith.constant 1.000000e-01 : f32
    %40 = vector.broadcast %cst_23 : f32 to vector<104x8xf32>
    %41 = arith.addf %39, %40 : vector<104x8xf32>
    %c0_24 = arith.constant 0 : index
    %c0_25 = arith.constant 0 : index
    %42 = vector.load %arg10[%c0_24, %c0_25] : memref<104x8xf32, #tpu.memory_space<vmem>>, vector<104x8xf32>
    tpu.vector_store %arg10[%c0_24, %c0_25], %18 {strides = array<i32>} : memref<104x8xf32, #tpu.memory_space<vmem>>, vector<104x8xf32>,
    %c0_26 = arith.constant 0 : index
    %c0_27 = arith.constant 0 : index
    %43 = vector.load %arg11[%c0_26, %c0_27] : memref<104x8xf32, #tpu.memory_space<vmem>>, vector<104x8xf32>
    tpu.vector_store %arg11[%c0_26, %c0_27], %41 {strides = array<i32>} : memref<104x8xf32, #tpu.memory_space<vmem>>, vector<104x8xf32>,
    return
  }
  func.func @transform_0(%arg0: i32) -> (i32, i32) {
    %c0_i32 = arith.constant 0 : i32
    %c0_i32_0 = arith.constant 0 : i32
    return %arg0, %c0_i32 : i32, i32
  }
  func.func @transform_1(%arg0: i32) -> (i32, i32) {
    %c0_i32 = arith.constant 0 : i32
    %c0_i32_0 = arith.constant 0 : i32
    %c0_i32_1 = arith.constant 0 : i32
    return %c0_i32, %c0_i32_0 : i32, i32
  }
  func.func @transform_2(%arg0: i32) -> (i32, i32) {
    %c0_i32 = arith.constant 0 : i32
    %c0_i32_0 = arith.constant 0 : i32
    %c0_i32_1 = arith.constant 0 : i32
    return %c0_i32, %c0_i32_0 : i32, i32
  }
  func.func @transform_3(%arg0: i32) -> (i32, i32) {
    %c0_i32 = arith.constant 0 : i32
    %c0_i32_0 = arith.constant 0 : i32
    %c0_i32_1 = arith.constant 0 : i32
    return %c0_i32, %c0_i32_0 : i32, i32
  }
  func.func @transform_4(%arg0: i32) -> (i32, i32) {
    %c0_i32 = arith.constant 0 : i32
    %c0_i32_0 = arith.constant 0 : i32
    %c0_i32_1 = arith.constant 0 : i32
    return %c0_i32, %c0_i32_0 : i32, i32
  }
  func.func @transform_5(%arg0: i32) -> (i32, i32) {
    %c0_i32 = arith.constant 0 : i32
    %c0_i32_0 = arith.constant 0 : i32
    %c0_i32_1 = arith.constant 0 : i32
    return %c0_i32, %c0_i32_0 : i32, i32
  }
  func.func @transform_6(%arg0: i32) -> (i32, i32) {
    %c0_i32 = arith.constant 0 : i32
    %c0_i32_0 = arith.constant 0 : i32
    %c0_i32_1 = arith.constant 0 : i32
    return %c0_i32, %c0_i32_0 : i32, i32
  }
  func.func @transform_7(%arg0: i32) -> (i32, i32) {
    %c0_i32 = arith.constant 0 : i32
    %c0_i32_0 = arith.constant 0 : i32
    %c0_i32_1 = arith.constant 0 : i32
    return %c0_i32, %c0_i32_0 : i32, i32
  }
  func.func @transform_8(%arg0: i32) -> (i32, i32) {
    %c0_i32 = arith.constant 0 : i32
    %c0_i32_0 = arith.constant 0 : i32
    %c0_i32_1 = arith.constant 0 : i32
    return %c0_i32, %c0_i32_0 : i32, i32
  }
  func.func @transform_9(%arg0: i32) -> (i32, i32) {
    %c0_i32 = arith.constant 0 : i32
    %c0_i32_0 = arith.constant 0 : i32
    return %arg0, %c0_i32 : i32, i32
  }
  func.func @transform_10(%arg0: i32) -> (i32, i32) {
    %c0_i32 = arith.constant 0 : i32
    %c0_i32_0 = arith.constant 0 : i32
    return %arg0, %c0_i32 : i32, i32
  }
}

</mosaic_0001>

<bundles_post_ra>
// kernel: tpu_custom_call.1
= control target key start
LH: loop header
LB: loop body
LE: loop exit
PB: predicated region body
PF: predicated region fallthrough
CT: control target
= control target key end

     0   :  { %s2074_s13 = smov 0   ;;  %s2831_s0 = inlined_call_operand.vmem [shape: f32[208,32], index: 0, kind: input, shape index: {}]   ;;  %s2832_s1 = inlined_call_operand.vmem [shape: f32[32,128], index: 1, kind: input, shape index: {}]   ;;  %s2833_s2 = inlined_call_operand.vmem [shape: f32[1,128], index: 2, kind: input, shape index: {}]   ;;  %s2834_s3 = inlined_call_operand.vmem [shape: f32[128,128], index: 3, kind: input, shape index: {}]   ;;  %s2835_s4 = inlined_call_operand.vmem [shape: f32[1,128], index: 4, kind: input, shape index: {}]   ;;  %s2836_s5 = inlined_call_operand.vmem [shape: f32[128,8], index: 5, kind: input, shape index: {}]   ;;  %s2837_s6 = inlined_call_operand.vmem [shape: f32[1,8], index: 6, kind: input, shape index: {}]   ;;  %s2838_s7 = inlined_call_operand.vmem [shape: f32[128,8], index: 7, kind: input, shape index: {}]   ;;  %s2839_s8 = inlined_call_operand.vmem [shape: f32[1,8], index: 8, kind: input, shape index: {}]   ;;  %s2840_s9 = inlined_call_operand.vmem [shape: f32[208,8], index: 9, kind: output, shape index: {0}]   ;;  %s2841_s10 = inlined_call_operand.vmem [shape: f32[208,8], index: 10, kind: output, shape index: {1}]  }
   0x1 LB: > { %s1446_s14 = sadd.s32 4294967295, %s2015_s13   ;;  %p1450_p0 = scmp.ge.s32.totalorder %s2015_s13, 1  ;;  %s2015_s13 = sphi %s2074_s13, %s21_s13  }
   0x2   : > { %p316_p1 = scmp.lt.s32.totalorder %s2015_s13, 3 }
   0x4   : > { %p317_p2 = pnand %p1450_p0, %p316_p1 }
   0x5   : > { %s359_s17 = smul.u32 (!%p317_p2), 13, %s1446_s14 }
   0x6   : > { %320 = sbr.rel (%p317_p2) target bundleno = 748 (0x2ec), region = 56 }
   0x7   : > { %p360_p3 = scmp.lt.s32.totalorder (!%p317_p2), %s359_s17, 25 }
   0xb   : > { %v393_v0 = vld [vmem:[%s2832_s1 + $0x18] sm:$0xff]  ;;  %v2017_v1 = vmov 0.0   ;;  %v392_v2 = vld [vmem:[%s2832_s1 + $0x10] sm:$0xff]  ;;  %vm2018_vm0 = vmmov 0   ;;  %v391_v5 = vld [vmem:[%s2832_s1 + $0x8] sm:$0xff]  ;;  %s2847_s17 = smov (!%p360_p3, %s359_s17), 25 }
   0xc   : > { %1577 = vmatprep.subr.mxu0 %v2017_v1  ;;  %1585 = vmatprep.mubr.msk.f32.mxu0 %vm2018_vm0, %v2017_v1  ;;  %v599_v3 = vld [vmem:[%s2834_s3 + $0x78] sm:$0xff]  ;;  %v598_v4 = vld [vmem:[%s2834_s3 + $0x70] sm:$0xff]  ;;  %v597_v6 = vld [vmem:[%s2834_s3 + $0x68] sm:$0xff]  ;;  %s2110_s30 = sshll.u32 %s2847_s17, 3  ;;  %vm401_vm1 = vcmask 261120   ;;  %vm1329_vm2 = vcmask 64512  }
   0xd   : > { %1578 = vmatpush3.msra.mxu0 %v393_v0  ;;  %1624 = vmatprep.subr.mxu1 %v2017_v1  ;;  %v390_v7 = vld [vmem:[%s2832_s1] sm:$0xff]  ;;  %s2121_s16 = scalar_lea.vmem %s2831_s0, %s2110_s30  ;;  %v595_v10 = vld [vmem:[%s2834_s3 + $0x58] sm:$0xff]  ;;  %v594_v12 = vld [vmem:[%s2834_s3 + $0x50] sm:$0xff]  ;;  %s2575_s25 = scalar_lea.vmem %s2840_s9, %s2110_s30 }
   0xe   : > { %1579 = vmatprep.subr.mxu0 %v2017_v1  ;;  %1625 = vmatpush3.msra.mxu1 %v599_v3  ;;  %v596_v8 = vld [vmem:[%s2834_s3 + $0x60] sm:$0xff]  ;;  %v378_v11 = vld [vmem:[%s2121_s16 + $0x8] sm:$0xff]  ;;  %v379_v14 = vld [vmem:[%s2121_s16 + $0x10] sm:$0xff]  ;;  %s2687_s28 = scalar_lea.vmem %s2841_s10, %s2110_s30 }
   0xf   : > { %1580 = vmatpush3.msra.mxu0 %v392_v2  ;;  %1626 = vmatprep.subr.mxu1 %v2017_v1  ;;  %v377_v9 = vld [vmem:[%s2121_s16] sm:$0xff]  ;;  %v593_v13 = vld [vmem:[%s2834_s3 + $0x48] sm:$0xff]  ;;  %v380_v15 = vld [vmem:[%s2121_s16 + $0x18] sm:$0xff] }
  0x10   : > { %1581 = vmatprep.subr.mxu0 %v2017_v1  ;;  %1627 = vmatpush3.msra.mxu1 %v598_v4  ;;  %v381_v16 = vld [vmem:[%s2121_s16 + $0x20] sm:$0xff]  ;;  %v382_v17 = vld [vmem:[%s2121_s16 + $0x28] sm:$0xff]  ;;  %v383_v18 = vld [vmem:[%s2121_s16 + $0x30] sm:$0xff] }
  0x11   : > { %1582 = vmatpush3.msra.mxu0 %v391_v5  ;;  %1628 = vmatprep.subr.mxu1 %v2017_v1  ;;  %v384_v19 = vld [vmem:[%s2121_s16 + $0x38] sm:$0xff]  ;;  %v385_v20 = vld [vmem:[%s2121_s16 + $0x40] sm:$0xff]  ;;  %v386_v21 = vld [vmem:[%s2121_s16 + $0x48] sm:$0xff] }
  0x12   : > { %1583 = vmatprep.subr.mxu0 %v2017_v1  ;;  %1629 = vmatpush3.msra.mxu1 %v597_v6  ;;  %v387_v22 = vld [vmem:[%s2121_s16 + $0x50] sm:$0xff]  ;;  %v388_v23 = vld [vmem:[%s2121_s16 + $0x58] sm:$0xff]  ;;  %v389_v24 = vld [vmem:[%s2121_s16 + $0x60] sm:$0xff] }
  0x13   : > { %1584 = vmatpush3.msra.mxu0 %v390_v7  ;;  %1630 = vmatprep.subr.mxu1 %v2017_v1  ;;  %v592_v25 = vld [vmem:[%s2834_s3 + $0x40] sm:$0xff]  ;;  %v591_v26 = vld [vmem:[%s2834_s3 + $0x38] sm:$0xff]  ;;  %v590_v27 = vld [vmem:[%s2834_s3 + $0x30] sm:$0xff] }
  0x14   : > { %1586 = vmatmul.mubr.msk.f32.vlgmr.msra.gmra.mxu0 %vm401_vm1, %v377_v9  ;;  %1631 = vmatpush3.msra.mxu1 %v596_v8  ;;  %v589_v28 = vld [vmem:[%s2834_s3 + $0x28] sm:$0xff]  ;;  %v588_v29 = vld [vmem:[%s2834_s3 + $0x20] sm:$0xff]  ;;  %v587_v30 = vld [vmem:[%s2834_s3 + $0x18] sm:$0xff] }
  0x15   : > { %1588 = vmatprep.mubr.msk.f32.mxu0 %vm2018_vm0, %v2017_v1  ;;  %1632 = vmatprep.subr.mxu1 %v2017_v1  ;;  %v586_v31 = vld [vmem:[%s2834_s3 + $0x10] sm:$0xff]  ;;  %v585_v32 = vld [vmem:[%s2834_s3 + $0x8] sm:$0xff]  ;;  %v584_v33 = vld [vmem:[%s2834_s3] sm:$0xff] }
  0x16   : > { %1633 = vmatpush3.msra.mxu1 %v595_v10  ;;  %1656 = vmatprep.mubr.msk.f32.mxu1 %vm2018_vm0, %v2017_v1  ;;  %v765_v34 = vld [vmem:[%s2836_s5 + $0x78] sm:$0xff]  ;;  %v764_v35 = vld [vmem:[%s2836_s5 + $0x70] sm:$0xff]  ;;  %v763_v36 = vld [vmem:[%s2836_s5 + $0x68] sm:$0xff] }
  0x17   : > { %1634 = vmatprep.subr.mxu1 %v2017_v1  ;;  %1695 = vmatprep.subr.mxu0 %v2017_v1  ;;  %v762_v37 = vld [vmem:[%s2836_s5 + $0x60] sm:$0xff]  ;;  %v761_v38 = vld [vmem:[%s2836_s5 + $0x58] sm:$0xff]  ;;  %v760_v39 = vld [vmem:[%s2836_s5 + $0x50] sm:$0xff] }
  0x18   : > { %1589 = vmatmul.mubr.msk.f32.gmra.mxu0 %vm401_vm1, %v378_v11  ;;  %1635 = vmatpush3.msra.mxu1 %v594_v12  ;;  %v759_v40 = vld [vmem:[%s2836_s5 + $0x48] sm:$0xff]  ;;  %v758_v41 = vld [vmem:[%s2836_s5 + $0x40] sm:$0xff]  ;;  %v757_v42 = vld [vmem:[%s2836_s5 + $0x38] sm:$0xff] }
  0x19   : > { %1591 = vmatprep.mubr.msk.f32.mxu0 %vm2018_vm0, %v2017_v1  ;;  %1636 = vmatprep.subr.mxu1 %v2017_v1  ;;  %v756_v43 = vld [vmem:[%s2836_s5 + $0x30] sm:$0xff]  ;;  %v755_v44 = vld [vmem:[%s2836_s5 + $0x28] sm:$0xff]  ;;  %v2275_v45 = vld [vmem:[%s2833_s2] ss:$0 sm:$0xff] }
  0x1a   : > { %1637 = vmatpush3.msra.mxu1 %v593_v13  ;;  %1696 = vmatpush3.msra.mxu0 %v765_v34  ;;  %v2284_v58 = vld [vmem:[%s2838_s7 + $0x78] sm:$0xff]  ;;  %v2290_v62 = vld [vmem:[%s2838_s7 + $0x70] sm:$0xff]  ;;  %v2299_v0 = vld [vmem:[%s2838_s7 + $0x68] sm:$0xff] }
  0x1b   : > { %1638 = vmatprep.subr.mxu1 %v2017_v1  ;;  %1697 = vmatprep.subr.mxu0 %v2017_v1  ;;  %v2307_v5 = vld [vmem:[%s2838_s7 + $0x60] sm:$0xff] }
  0x1c   : > { %1592 = vmatmul.mubr.msk.f32.gmra.mxu0 %vm401_vm1, %v379_v14  ;;  %1639 = vmatpush3.msra.mxu1 %v592_v25 }
  0x1d   : > { %1594 = vmatprep.mubr.msk.f32.mxu0 %vm2018_vm0, %v2017_v1  ;;  %1640 = vmatprep.subr.mxu1 %v2017_v1 }
  0x1e   : > { %1641 = vmatpush3.msra.mxu1 %v591_v26  ;;  %1698 = vmatpush3.msra.mxu0 %v764_v35 }
  0x1f   : > { %1642 = vmatprep.subr.mxu1 %v2017_v1  ;;  %1699 = vmatprep.subr.mxu0 %v2017_v1 }
  0x20   : > { %1595 = vmatmul.mubr.msk.f32.gmra.mxu0 %vm401_vm1, %v380_v15  ;;  %1643 = vmatpush3.msra.mxu1 %v590_v27 }
  0x21   : > { %1597 = vmatprep.mubr.msk.f32.mxu0 %vm2018_vm0, %v2017_v1  ;;  %1644 = vmatprep.subr.mxu1 %v2017_v1 }
  0x22   : > { %1645 = vmatpush3.msra.mxu1 %v589_v28  ;;  %1700 = vmatpush3.msra.mxu0 %v763_v36 }
  0x23   : > { %1646 = vmatprep.subr.mxu1 %v2017_v1  ;;  %1701 = vmatprep.subr.mxu0 %v2017_v1 }
  0x24   : > { %1598 = vmatmul.mubr.msk.f32.gmra.mxu0 %vm401_vm1, %v381_v16  ;;  %1647 = vmatpush3.msra.mxu1 %v588_v29 }
  0x25   : > { %1600 = vmatprep.mubr.msk.f32.mxu0 %vm2018_vm0, %v2017_v1  ;;  %1648 = vmatprep.subr.mxu1 %v2017_v1 }
  0x26   : > { %1649 = vmatpush3.msra.mxu1 %v587_v30  ;;  %1702 = vmatpush3.msra.mxu0 %v762_v37 }
  0x27   : > { %1650 = vmatprep.subr.mxu1 %v2017_v1  ;;  %1703 = vmatprep.subr.mxu0 %v2017_v1 }
  0x28   : > { %1601 = vmatmul.mubr.msk.f32.gmra.mxu0 %vm401_vm1, %v382_v17  ;;  %1651 = vmatpush3.msra.mxu1 %v586_v31 }
  0x29   : > { %1603 = vmatprep.mubr.msk.f32.mxu0 %vm2018_vm0, %v2017_v1  ;;  %1652 = vmatprep.subr.mxu1 %v2017_v1 }
  0x2a   : > { %1653 = vmatpush3.msra.mxu1 %v585_v32  ;;  %1704 = vmatpush3.msra.mxu0 %v761_v38 }
  0x2b   : > { %1654 = vmatprep.subr.mxu1 %v2017_v1  ;;  %1705 = vmatprep.subr.mxu0 %v2017_v1 }
  0x2c   : > { %1604 = vmatmul.mubr.msk.f32.gmra.mxu0 %vm401_vm1, %v383_v18  ;;  %1655 = vmatpush3.msra.mxu1 %v584_v33 }
  0x2d   : > { %1606 = vmatprep.mubr.msk.f32.mxu0 %vm2018_vm0, %v2017_v1  ;;  %1837 = vmatprep.subr.mxu1 %v2017_v1 }
  0x2e   : > { %1706 = vmatpush3.msra.mxu0 %v760_v39  ;;  %v754_v39 = vld [vmem:[%s2836_s5 + $0x20] sm:$0xff] }
  0x2f   : > { %1707 = vmatprep.subr.mxu0 %v2017_v1 }
  0x30   : > { %1607 = vmatmul.mubr.msk.f32.gmra.mxu0 %vm401_vm1, %v384_v19 }
  0x31   : > { %1609 = vmatprep.mubr.msk.f32.mxu0 %vm2018_vm0, %v2017_v1  ;;  %1708 = vmatpush3.msra.mxu0 %v759_v40  ;;  %v2350_v40 = vld [vmem:[%s2838_s7 + $0x58] sm:$0xff] }
  0x32   : > { %1709 = vmatprep.subr.mxu0 %v2017_v1 }
  0x33   : > { %1710 = vmatpush3.msra.mxu0 %v758_v41  ;;  %v753_v41 = vld [vmem:[%s2836_s5 + $0x18] sm:$0xff] }
  0x34   : > { %1610 = vmatmul.mubr.msk.f32.gmra.mxu0 %vm401_vm1, %v385_v20  ;;  %1711 = vmatprep.subr.mxu0 %v2017_v1 }
  0x35   : > { %1612 = vmatprep.mubr.msk.f32.mxu0 %vm2018_vm0, %v2017_v1  ;;  %1712 = vmatpush3.msra.mxu0 %v757_v42  ;;  %v2361_v42 = vld [vmem:[%s2838_s7 + $0x50] sm:$0xff] }
  0x36   : > { %1713 = vmatprep.subr.mxu0 %v2017_v1 }
  0x37   : > { %1714 = vmatpush3.msra.mxu0 %v756_v43  ;;  %v2369_v43 = vld [vmem:[%s2838_s7 + $0x48] sm:$0xff] }
  0x38   : > { %1613 = vmatmul.mubr.msk.f32.gmra.mxu0 %vm401_vm1, %v386_v21  ;;  %1715 = vmatprep.subr.mxu0 %v2017_v1 }
  0x39   : > { %1615 = vmatprep.mubr.msk.f32.mxu0 %vm2018_vm0, %v2017_v1  ;;  %1716 = vmatpush3.msra.mxu0 %v755_v44  ;;  %v752_v44 = vld [vmem:[%s2836_s5 + $0x10] sm:$0xff] }
  0x3a   : > { %1717 = vmatprep.subr.mxu0 %v2017_v1 }
  0x3b   : > { %1718 = vmatpush3.msra.mxu0 %v754_v39 }
  0x3c   : > { %1616 = vmatmul.mubr.msk.f32.gmra.mxu0 %vm401_vm1, %v387_v22  ;;  %1719 = vmatprep.subr.mxu0 %v2017_v1 }
  0x3d   : > { %1618 = vmatprep.mubr.msk.f32.mxu0 %vm2018_vm0, %v2017_v1  ;;  %1720 = vmatpush3.msra.mxu0 %v753_v41 }
  0x3e   : > { %1721 = vmatprep.subr.mxu0 %v2017_v1 }
  0x3f   : > { %1722 = vmatpush3.msra.mxu0 %v752_v44 }
  0x40   : > { %1619 = vmatmul.mubr.msk.f32.gmra.mxu0 %vm401_vm1, %v388_v23  ;;  %1723 = vmatprep.subr.mxu0 %v2017_v1 }
  0x41   : > { %1621 = vmatprep.mubr.msk.f32.mxu0 %vm2018_vm0, %v2017_v1 }
  0x44   : > { %1622 = vmatmul.mubr.msk.f32.gmra.mxu0 %vm401_vm1, %v389_v24 }
  0x45   : > { %1727 = vmatprep.mubr.msk.f32.mxu0 %vm2018_vm0, %v2017_v1 }
  0xd4   : > { %v507_v46 = vpop.f32.mrf.mxu0 }
  0xd5   : > { %v508_v47 = vadd.f32 %v2275_v45, %v507_v46  ;;  %v2382_v46 = vld [vmem:[%s2838_s7 + $0x40] sm:$0xff] }
  0xd6   : > { %v1587_v48 = vpop.f32.mrf.mxu0 }
  0xd7   : > { %1879 = vtanh.f32 %v508_v47  ;;  %v2390_v47 = vld [vmem:[%s2838_s7 + $0x38] sm:$0xff]  ;;  %v750_v48 = vld [vmem:[%s2836_s5] sm:$0xff] }
  0xd8   : > { %v512_v49 = vpop.f32.mrf.mxu0 }
  0xd9   : > { %v513_v50 = vadd.f32 %v2275_v45, %v512_v49  ;;  %v2401_v49 = vld [vmem:[%s2838_s7 + $0x30] sm:$0xff] }
  0xda   : > { %v1590_v51 = vpop.f32.mrf.mxu0 }
  0xdb   : > { %1881 = vtanh.f32 %v513_v50  ;;  %v2409_v50 = vld [vmem:[%s2838_s7 + $0x28] sm:$0xff]  ;;  %v2416_v51 = vld [vmem:[%s2838_s7 + $0x20] sm:$0xff] }
  0xdc   : > { %v517_v52 = vpop.f32.mrf.mxu0 }
  0xdd   : > { %v518_v53 = vadd.f32 %v2275_v45, %v517_v52  ;;  %v2423_v52 = vld [vmem:[%s2838_s7 + $0x18] sm:$0xff] }
  0xde   : > { %v1593_v54 = vpop.f32.mrf.mxu0 }
  0xdf   : > { %1883 = vtanh.f32 %v518_v53  ;;  %v2430_v53 = vld [vmem:[%s2838_s7 + $0x10] sm:$0xff]  ;;  %v2437_v54 = vld [vmem:[%s2838_s7 + $0x8] sm:$0xff] }
  0xe0   : > { %v522_v55 = vpop.f32.mrf.mxu0 }
  0xe1   : > { %v523_v56 = vadd.f32 %v2275_v45, %v522_v55  ;;  %v2444_v55 = vld [vmem:[%s2838_s7] sm:$0xff] }
  0xe2   : > { %v1596_v57 = vpop.f32.mrf.mxu0 }
  0xe3   : > { %1885 = vtanh.f32 %v523_v56  ;;  %v2450_v56 = vld [vmem:[%s2835_s4] ss:$0 sm:$0xff] }
  0xe4   : > { %v1880_v59 = vpop.eup %1879  ;;  %v527_v60 = vpop.f32.mrf.mxu0 }
  0xe5   : > { %v528_v61 = vadd.f32 %v2275_v45, %v527_v60  ;;  %1657 = vmatmul.mubr.f32.vlgmr.msra.gmra.mxu1 %v1880_v59 }
  0xe6   : > { %v1599_v63 = vpop.f32.mrf.mxu0  ;;  %1659 = vmatprep.mubr.msk.f32.mxu1 %vm2018_vm0, %v2017_v1  ;;  %1853 = vmatpush3.msra.mxu1 %v2284_v58 }
  0xe7   : > { %1887 = vtanh.f32 %v528_v61  ;;  %1838 = vmatprep.subr.mxu1 %v2017_v1 }
  0xe8   : > { %v1882_v2 = vpop.eup %1881  ;;  %v532_v3 = vpop.f32.mrf.mxu0  ;;  %1854 = vmatpush3.msra.mxu1 %v2290_v62 }
  0xe9   : > { %v533_v4 = vadd.f32 %v2275_v45, %v532_v3  ;;  %1660 = vmatmul.mubr.f32.gmra.mxu1 %v1882_v2  ;;  %1839 = vmatprep.subr.mxu1 %v2017_v1 }
  0xea   : > { %v1602_v6 = vpop.f32.mrf.mxu0  ;;  %1662 = vmatprep.mubr.msk.f32.mxu1 %vm2018_vm0, %v2017_v1  ;;  %1855 = vmatpush3.msra.mxu1 %v2299_v0 }
  0xeb   : > { %1889 = vtanh.f32 %v533_v4  ;;  %1840 = vmatprep.subr.mxu1 %v2017_v1 }
  0xec   : > { %v1884_v7 = vpop.eup %1883  ;;  %v537_v8 = vpop.f32.mrf.mxu0  ;;  %1856 = vmatpush3.msra.mxu1 %v2307_v5 }
  0xed   : > { %v538_v9 = vadd.f32 %v2275_v45, %v537_v8  ;;  %1663 = vmatmul.mubr.f32.gmra.mxu1 %v1884_v7  ;;  %1841 = vmatprep.subr.mxu1 %v2017_v1 }
  0xee   : > { %v1605_v10 = vpop.f32.mrf.mxu0  ;;  %1665 = vmatprep.mubr.msk.f32.mxu1 %vm2018_vm0, %v2017_v1  ;;  %1857 = vmatpush3.msra.mxu1 %v2350_v40 }
  0xef   : > { %1891 = vtanh.f32 %v538_v9  ;;  %1842 = vmatprep.subr.mxu1 %v2017_v1 }
  0xf0   : > { %v1886_v11 = vpop.eup %1885  ;;  %v542_v12 = vpop.f32.mrf.mxu0  ;;  %1858 = vmatpush3.msra.mxu1 %v2361_v42 }
  0xf1   : > { %v543_v13 = vadd.f32 %v2275_v45, %v542_v12  ;;  %1666 = vmatmul.mubr.f32.gmra.mxu1 %v1886_v11  ;;  %1843 = vmatprep.subr.mxu1 %v2017_v1 }
  0xf2   : > { %v1608_v14 = vpop.f32.mrf.mxu0  ;;  %1668 = vmatprep.mubr.msk.f32.mxu1 %vm2018_vm0, %v2017_v1  ;;  %1859 = vmatpush3.msra.mxu1 %v2369_v43 }
  0xf3   : > { %1893 = vtanh.f32 %v543_v13  ;;  %1844 = vmatprep.subr.mxu1 %v2017_v1 }
  0xf4   : > { %v1888_v15 = vpop.eup %1887  ;;  %v547_v16 = vpop.f32.mrf.mxu0  ;;  %1860 = vmatpush3.msra.mxu1 %v2382_v46 }
  0xf5   : > { %v548_v17 = vadd.f32 %v2275_v45, %v547_v16  ;;  %1669 = vmatmul.mubr.f32.gmra.mxu1 %v1888_v15  ;;  %1845 = vmatprep.subr.mxu1 %v2017_v1 }
  0xf6   : > { %v1611_v18 = vpop.f32.mrf.mxu0  ;;  %1671 = vmatprep.mubr.msk.f32.mxu1 %vm2018_vm0, %v2017_v1  ;;  %1861 = vmatpush3.msra.mxu1 %v2390_v47 }
  0xf7   : > { %1895 = vtanh.f32 %v548_v17  ;;  %1846 = vmatprep.subr.mxu1 %v2017_v1 }
  0xf8   : > { %v1890_v19 = vpop.eup %1889  ;;  %v552_v20 = vpop.f32.mrf.mxu0  ;;  %1862 = vmatpush3.msra.mxu1 %v2401_v49 }
  0xf9   : > { %v553_v21 = vadd.f32 %v2275_v45, %v552_v20  ;;  %1672 = vmatmul.mubr.f32.gmra.mxu1 %v1890_v19  ;;  %1847 = vmatprep.subr.mxu1 %v2017_v1 }
  0xfa   : > { %v1614_v22 = vpop.f32.mrf.mxu0  ;;  %1674 = vmatprep.mubr.msk.f32.mxu1 %vm2018_vm0, %v2017_v1  ;;  %1863 = vmatpush3.msra.mxu1 %v2409_v50 }
  0xfb   : > { %1897 = vtanh.f32 %v553_v21  ;;  %1848 = vmatprep.subr.mxu1 %v2017_v1 }
  0xfc   : > { %v1892_v23 = vpop.eup %1891  ;;  %v557_v24 = vpop.f32.mrf.mxu0  ;;  %1864 = vmatpush3.msra.mxu1 %v2416_v51 }
  0xfd   : > { %v558_v25 = vadd.f32 %v2275_v45, %v557_v24  ;;  %1675 = vmatmul.mubr.f32.gmra.mxu1 %v1892_v23  ;;  %1849 = vmatprep.subr.mxu1 %v2017_v1 }
  0xfe   : > { %v1617_v26 = vpop.f32.mrf.mxu0  ;;  %1677 = vmatprep.mubr.msk.f32.mxu1 %vm2018_vm0, %v2017_v1  ;;  %1865 = vmatpush3.msra.mxu1 %v2423_v52 }
  0xff   : > { %1899 = vtanh.f32 %v558_v25  ;;  %1850 = vmatprep.subr.mxu1 %v2017_v1 }
 0x100   : > { %v1894_v27 = vpop.eup %1893  ;;  %v562_v28 = vpop.f32.mrf.mxu0  ;;  %1866 = vmatpush3.msra.mxu1 %v2430_v53 }
 0x101   : > { %v563_v29 = vadd.f32 %v2275_v45, %v562_v28  ;;  %1678 = vmatmul.mubr.f32.gmra.mxu1 %v1894_v27  ;;  %1851 = vmatprep.subr.mxu1 %v2017_v1 }
 0x102   : > { %v1620_v30 = vpop.f32.mrf.mxu0  ;;  %1680 = vmatprep.mubr.msk.f32.mxu1 %vm2018_vm0, %v2017_v1  ;;  %1867 = vmatpush3.msra.mxu1 %v2437_v54 }
 0x103   : > { %1901 = vtanh.f32 %v563_v29  ;;  %1852 = vmatprep.subr.mxu1 %v2017_v1 }
 0x104   : > { %v1896_v31 = vpop.eup %1895  ;;  %v567_v32 = vpop.f32.mrf.mxu0  ;;  %1868 = vmatpush3.msra.mxu1 %v2444_v55 }
 0x105   : > { %v568_v33 = vadd.f32 %v2275_v45, %v567_v32  ;;  %1681 = vmatmul.mubr.f32.gmra.mxu1 %v1896_v31  ;;  %v751_v45 = vld [vmem:[%s2836_s5 + $0x8] sm:$0xff] }
 0x106   : > { %v1623_v34 = vpop.f32.mrf.mxu0  ;;  %1683 = vmatprep.mubr.msk.f32.mxu1 %vm2018_vm0, %v2017_v1  ;;  %1724 = vmatpush3.msra.mxu0 %v751_v45 }
 0x107   : > { %1903 = vtanh.f32 %v568_v33  ;;  %1725 = vmatprep.subr.mxu0 %v2017_v1 }
 0x108   : > { %v1898_v35 = vpop.eup %1897  ;;  %1726 = vmatpush3.msra.mxu0 %v750_v48 }
 0x109   : > { %1684 = vmatmul.mubr.f32.gmra.mxu1 %v1898_v35  ;;  %1766 = vmatprep.subr.mxu0 %v2017_v1 }
 0x10a   : > { %1686 = vmatprep.mubr.msk.f32.mxu1 %vm2018_vm0, %v2017_v1 }
 0x10c   : > { %v1900_v36 = vpop.eup %1899 }
 0x10d   : > { %1687 = vmatmul.mubr.f32.gmra.mxu1 %v1900_v36 }
 0x10e   : > { %1689 = vmatprep.mubr.msk.f32.mxu1 %vm2018_vm0, %v2017_v1 }
 0x110   : > { %v1902_v37 = vpop.eup %1901 }
 0x111   : > { %1690 = vmatmul.mubr.f32.gmra.mxu1 %v1902_v37 }
 0x112   : > { %1692 = vmatprep.mubr.msk.f32.mxu1 %vm2018_vm0, %v2017_v1 }
 0x114   : > { %v1904_v38 = vpop.eup %1903 }
 0x115   : > { %1693 = vmatmul.mubr.f32.gmra.mxu1 %v1904_v38 }
 0x116   : > { %1807 = vmatprep.mubr.msk.f32.mxu1 %vm2018_vm0, %v2017_v1 }
 0x1a5   : > { %v673_v57 = vpop.f32.mrf.mxu1 }
 0x1a6   : > { %v674_v59 = vadd.f32 %v2450_v56, %v673_v57 }
 0x1a7   : > { %v1658_v60 = vpop.f32.mrf.mxu1 }
 0x1a8   : > { %1905 = vtanh.f32 %v674_v59 }
 0x1a9   : > { %v678_v61 = vpop.f32.mrf.mxu1 }
 0x1aa   : > { %v679_v63 = vadd.f32 %v2450_v56, %v678_v61 }
 0x1ab   : > { %v1661_v2 = vpop.f32.mrf.mxu1 }
 0x1ac   : > { %1907 = vtanh.f32 %v679_v63 }
 0x1ad   : > { %v683_v3 = vpop.f32.mrf.mxu1 }
 0x1ae   : > { %v684_v4 = vadd.f32 %v2450_v56, %v683_v3 }
 0x1af   : > { %v1664_v6 = vpop.f32.mrf.mxu1 }
 0x1b0   : > { %1909 = vtanh.f32 %v684_v4 }
 0x1b1   : > { %v688_v7 = vpop.f32.mrf.mxu1 }
 0x1b2   : > { %v689_v8 = vadd.f32 %v2450_v56, %v688_v7 }
 0x1b3   : > { %v1667_v9 = vpop.f32.mrf.mxu1 }
 0x1b4   : > { %1911 = vtanh.f32 %v689_v8 }
 0x1b5   : > { %v2456_v10 = vpop.eup %1905  ;;  %v693_v11 = vpop.f32.mrf.mxu1 }
 0x1b6   : > { %v694_v12 = vadd.f32 %v2450_v56, %v693_v11  ;;  %1728 = vmatmul.mubr.f32.vlgmr.msra.gmra.mxu0 %v2456_v10 }
 0x1b7   : > { %1767 = vmatpush3.msra.mxu0 %v2284_v58  ;;  %v1670_v13 = vpop.f32.mrf.mxu1  ;;  %1730 = vmatprep.mubr.msk.f32.mxu0 %vm2018_vm0, %v2017_v1 }
 0x1b8   : > { %1913 = vtanh.f32 %v694_v12  ;;  %1768 = vmatprep.subr.mxu0 %v2017_v1 }
 0x1b9   : > { %v2464_v14 = vpop.eup %1907  ;;  %v698_v15 = vpop.f32.mrf.mxu1  ;;  %1769 = vmatpush3.msra.mxu0 %v2290_v62 }
 0x1ba   : > { %v699_v16 = vadd.f32 %v2450_v56, %v698_v15  ;;  %1731 = vmatmul.mubr.f32.gmra.mxu0 %v2464_v14  ;;  %1770 = vmatprep.subr.mxu0 %v2017_v1 }
 0x1bb   : > { %v1673_v17 = vpop.f32.mrf.mxu1  ;;  %1733 = vmatprep.mubr.msk.f32.mxu0 %vm2018_vm0, %v2017_v1  ;;  %1771 = vmatpush3.msra.mxu0 %v2299_v0 }
 0x1bc   : > { %1915 = vtanh.f32 %v699_v16  ;;  %1772 = vmatprep.subr.mxu0 %v2017_v1 }
 0x1bd   : > { %v2474_v58 = vpop.eup %1909  ;;  %v703_v18 = vpop.f32.mrf.mxu1  ;;  %1773 = vmatpush3.msra.mxu0 %v2307_v5 }
 0x1be   : > { %v704_v62 = vadd.f32 %v2450_v56, %v703_v18  ;;  %1734 = vmatmul.mubr.f32.gmra.mxu0 %v2474_v58  ;;  %1774 = vmatprep.subr.mxu0 %v2017_v1 }
 0x1bf   : > { %v1676_v19 = vpop.f32.mrf.mxu1  ;;  %1736 = vmatprep.mubr.msk.f32.mxu0 %vm2018_vm0, %v2017_v1  ;;  %1775 = vmatpush3.msra.mxu0 %v2350_v40 }
 0x1c0   : > { %1917 = vtanh.f32 %v704_v62  ;;  %1776 = vmatprep.subr.mxu0 %v2017_v1 }
 0x1c1   : > { %v1912_v0 = vpop.eup %1911  ;;  %v708_v20 = vpop.f32.mrf.mxu1  ;;  %1777 = vmatpush3.msra.mxu0 %v2361_v42 }
 0x1c2   : > { %v709_v5 = vadd.f32 %v2450_v56, %v708_v20  ;;  %1737 = vmatmul.mubr.f32.gmra.mxu0 %v1912_v0  ;;  %1808 = vmatmul.mubr.f32.vlgmr.msra.gmra.mxu1 %v1912_v0 }
 0x1c3   : > { %v1679_v21 = vpop.f32.mrf.mxu1  ;;  %1739 = vmatprep.mubr.msk.f32.mxu0 %vm2018_vm0, %v2017_v1  ;;  %1810 = vmatprep.mubr.msk.f32.mxu1 %vm2018_vm0, %v2017_v1 }
 0x1c4   : > { %1919 = vtanh.f32 %v709_v5  ;;  %1778 = vmatprep.subr.mxu0 %v2017_v1 }
 0x1c5   : > { %v1914_v22 = vpop.eup %1913  ;;  %v713_v23 = vpop.f32.mrf.mxu1  ;;  %1779 = vmatpush3.msra.mxu0 %v2369_v43 }
 0x1c6   : > { %v714_v24 = vadd.f32 %v2450_v56, %v713_v23  ;;  %1740 = vmatmul.mubr.f32.gmra.mxu0 %v1914_v22  ;;  %1811 = vmatmul.mubr.f32.gmra.mxu1 %v1914_v22 }
 0x1c7   : > { %v1682_v25 = vpop.f32.mrf.mxu1  ;;  %1742 = vmatprep.mubr.msk.f32.mxu0 %vm2018_vm0, %v2017_v1  ;;  %1813 = vmatprep.mubr.msk.f32.mxu1 %vm2018_vm0, %v2017_v1 }
 0x1c8   : > { %1921 = vtanh.f32 %v714_v24  ;;  %1780 = vmatprep.subr.mxu0 %v2017_v1 }
 0x1c9   : > { %v1916_v26 = vpop.eup %1915  ;;  %v718_v27 = vpop.f32.mrf.mxu1  ;;  %1781 = vmatpush3.msra.mxu0 %v2382_v46  ;;  %v2559_v46 = vld [vmem:[%s2837_s6] ss:$0 sm:$0xff] }
 0x1ca   : > { %v719_v28 = vadd.f32 %v2450_v56, %v718_v27  ;;  %1743 = vmatmul.mubr.f32.gmra.mxu0 %v1916_v26  ;;  %1814 = vmatmul.mubr.f32.gmra.mxu1 %v1916_v26 }
 0x1cb   : > { %v1685_v29 = vpop.f32.mrf.mxu1  ;;  %1745 = vmatprep.mubr.msk.f32.mxu0 %vm2018_vm0, %v2017_v1  ;;  %1816 = vmatprep.mubr.msk.f32.mxu1 %vm2018_vm0, %v2017_v1 }
 0x1cc   : > { %1923 = vtanh.f32 %v719_v28  ;;  %1782 = vmatprep.subr.mxu0 %v2017_v1 }
 0x1cd   : > { %v1918_v30 = vpop.eup %1917  ;;  %v723_v31 = vpop.f32.mrf.mxu1  ;;  %1783 = vmatpush3.msra.mxu0 %v2390_v47 }
 0x1ce   : > { %v724_v32 = vadd.f32 %v2450_v56, %v723_v31  ;;  %1746 = vmatmul.mubr.f32.gmra.mxu0 %v1918_v30  ;;  %1817 = vmatmul.mubr.f32.gmra.mxu1 %v1918_v30 }
 0x1cf   : > { %v1688_v33 = vpop.f32.mrf.mxu1  ;;  %1748 = vmatprep.mubr.msk.f32.mxu0 %vm2018_vm0, %v2017_v1  ;;  %1819 = vmatprep.mubr.msk.f32.mxu1 %vm2018_vm0, %v2017_v1 }
 0x1d0   : > { %1925 = vtanh.f32 %v724_v32  ;;  %1784 = vmatprep.subr.mxu0 %v2017_v1 }
 0x1d1   : > { %v1920_v34 = vpop.eup %1919  ;;  %v728_v35 = vpop.f32.mrf.mxu1  ;;  %1785 = vmatpush3.msra.mxu0 %v2401_v49 }
 0x1d2   : > { %v729_v36 = vadd.f32 %v2450_v56, %v728_v35  ;;  %1749 = vmatmul.mubr.f32.gmra.mxu0 %v1920_v34  ;;  %1820 = vmatmul.mubr.f32.gmra.mxu1 %v1920_v34 }
 0x1d3   : > { %v1691_v37 = vpop.f32.mrf.mxu1  ;;  %1751 = vmatprep.mubr.msk.f32.mxu0 %vm2018_vm0, %v2017_v1  ;;  %1822 = vmatprep.mubr.msk.f32.mxu1 %vm2018_vm0, %v2017_v1 }
 0x1d4   : > { %1927 = vtanh.f32 %v729_v36  ;;  %1786 = vmatprep.subr.mxu0 %v2017_v1 }
 0x1d5   : > { %v1922_v38 = vpop.eup %1921  ;;  %v733_v39 = vpop.f32.mrf.mxu1  ;;  %1787 = vmatpush3.msra.mxu0 %v2409_v50 }
 0x1d6   : > { %v734_v40 = vadd.f32 %v2450_v56, %v733_v39  ;;  %1752 = vmatmul.mubr.f32.gmra.mxu0 %v1922_v38  ;;  %1823 = vmatmul.mubr.f32.gmra.mxu1 %v1922_v38 }
 0x1d7   : > { %v1694_v41 = vpop.f32.mrf.mxu1  ;;  %1754 = vmatprep.mubr.msk.f32.mxu0 %vm2018_vm0, %v2017_v1  ;;  %1788 = vmatprep.subr.mxu0 %v2017_v1 }
 0x1d8   : > { %1929 = vtanh.f32 %v734_v40  ;;  %1825 = vmatprep.mubr.msk.f32.mxu1 %vm2018_vm0, %v2017_v1  ;;  %1789 = vmatpush3.msra.mxu0 %v2416_v51 }
 0x1d9   : > { %v1924_v42 = vpop.eup %1923  ;;  %1790 = vmatprep.subr.mxu0 %v2017_v1 }
 0x1da   : > { %1755 = vmatmul.mubr.f32.gmra.mxu0 %v1924_v42  ;;  %1826 = vmatmul.mubr.f32.gmra.mxu1 %v1924_v42 }
 0x1db   : > { %1757 = vmatprep.mubr.msk.f32.mxu0 %vm2018_vm0, %v2017_v1  ;;  %1791 = vmatpush3.msra.mxu0 %v2423_v52 }
 0x1dc   : > { %1828 = vmatprep.mubr.msk.f32.mxu1 %vm2018_vm0, %v2017_v1  ;;  %1792 = vmatprep.subr.mxu0 %v2017_v1 }
 0x1dd   : > { %v1926_v43 = vpop.eup %1925  ;;  %1793 = vmatpush3.msra.mxu0 %v2430_v53 }
 0x1de   : > { %1758 = vmatmul.mubr.f32.gmra.mxu0 %v1926_v43  ;;  %1829 = vmatmul.mubr.f32.gmra.mxu1 %v1926_v43 }
 0x1df   : > { %1760 = vmatprep.mubr.msk.f32.mxu0 %vm2018_vm0, %v2017_v1  ;;  %1831 = vmatprep.mubr.msk.f32.mxu1 %vm2018_vm0, %v2017_v1 }
 0x1e0   : > { %1794 = vmatprep.subr.mxu0 %v2017_v1 }
 0x1e1   : > { %v1928_v44 = vpop.eup %1927  ;;  %1795 = vmatpush3.msra.mxu0 %v2437_v54 }
 0x1e2   : > { %1761 = vmatmul.mubr.f32.gmra.mxu0 %v1928_v44  ;;  %1832 = vmatmul.mubr.f32.gmra.mxu1 %v1928_v44 }
 0x1e3   : > { %1763 = vmatprep.mubr.msk.f32.mxu0 %vm2018_vm0, %v2017_v1  ;;  %1834 = vmatprep.mubr.msk.f32.mxu1 %vm2018_vm0, %v2017_v1 }
 0x1e4   : > { %1796 = vmatprep.subr.mxu0 %v2017_v1 }
 0x1e5   : > { %v1930_v45 = vpop.eup %1929  ;;  %1797 = vmatpush3.msra.mxu0 %v2444_v55  ;;  %v2567_v55 = vld [vmem:[%s2839_s8] ss:$0 sm:$0xff] }
 0x1e6   : > { %1764 = vmatmul.mubr.f32.gmra.mxu0 %v1930_v45  ;;  %1835 = vmatmul.mubr.f32.gmra.mxu1 %v1930_v45 }
 0x1e7   : > { %1798 = vmatprep.mubr.msk.f32.mxu0 %vm2018_vm0, %v2017_v1 }
 0x1ea   : > { %1799 = vmatmul.mubr.f32.vlgmr.msra.gmra.mxu0 %v2456_v10 }
 0x1eb   : > { %1801 = vmatprep.mubr.msk.f32.mxu0 %vm2018_vm0, %v2017_v1 }
 0x1ee   : > { %1802 = vmatmul.mubr.f32.gmra.mxu0 %v2464_v14 }
 0x1ef   : > { %1804 = vmatprep.mubr.msk.f32.mxu0 %vm2018_vm0, %v2017_v1 }
 0x1f2   : > { %1805 = vmatmul.mubr.f32.gmra.mxu0 %v2474_v58 }
 0x276   : > { %v839_v47 = vpop.f32.mrf.mxu0 }
 0x277   : > { %v840_v48 = vadd.f32 %v2559_v46, %v839_v47 }
 0x278   : > { %v1729_v49 = vpop.f32.mrf.mxu0 }
 0x279   : > { %1931 = vtanh.f32 %v840_v48 }
 0x27a   : > { %v844_v50 = vpop.f32.mrf.mxu0 }
 0x27b   : > { %v845_v51 = vadd.f32 %v2559_v46, %v844_v50 }
 0x27c   : > { %v1732_v52 = vpop.f32.mrf.mxu0 }
 0x27d   : > { %1933 = vtanh.f32 %v845_v51 }
 0x27e   : > { %v849_v53 = vpop.f32.mrf.mxu0 }
 0x27f   : > { %v850_v1 = vadd.f32 %v2559_v46, %v849_v53 }
 0x280   : > { %v1735_v54 = vpop.f32.mrf.mxu0 }
 0x281   : > { %1935 = vtanh.f32 %v850_v1 }
 0x282   : > { %v854_v56 = vpop.f32.mrf.mxu0  ;;  %v1020_v57 = vpop.f32.mrf.mxu1 }
 0x283   : > { %v855_v59 = vadd.f32 %v2559_v46, %v854_v56  ;;  %v1021_v60 = vadd.f32 %v2567_v55, %v1020_v57 }
 0x284   : > { %v1738_v61 = vpop.f32.mrf.mxu0  ;;  %v1809_v63 = vpop.f32.mrf.mxu1 }
 0x285   : > { %1937 = vtanh.f32 %v855_v59  ;;  %v2577_v2 = vadd.f32 0.54132485, %v1021_v60 }
 0x286   : > { %v1932_v3 = vpop.eup %1931  ;;  %v859_v4 = vpop.f32.mrf.mxu0 }
 0x287   : > { %v1025_v6 = vpop.f32.mrf.mxu1  ;;  %1330 = vst.msk [vmem:[%s2575_s25] sm:$0xff] %vm1329_vm2, %v1932_v3  ;;  %v1124_v7 = vand.u32 2147483647, %v2577_v2  ;;  %v860_v8 = vadd.f32 %v2559_v46, %v859_v4  ;;  %vm1098_vm3 = vcmp.ne.f32.partialorder %v2577_v2, %v2577_v2 }
 0x288   : > { %v1026_v9 = vadd.f32 %v2567_v55, %v1025_v6  ;;  %v1741_v10 = vpop.f32.mrf.mxu0 }
 0x289   : > { %v1812_v11 = vpop.f32.mrf.mxu1  ;;  %v1137_v12 = vsub.f32 0.0, %v1124_v7  ;;  %1939 = vtanh.f32 %v860_v8 }
 0x28a   : > { %v1934_v13 = vpop.eup %1933  ;;  %v2584_v14 = vadd.f32 0.54132485, %v1026_v9  ;;  %v864_v15 = vpop.f32.mrf.mxu0 }
 0x28b   : > { %v1030_v16 = vpop.f32.mrf.mxu1  ;;  %1331 = vst.msk [vmem:[%s2575_s25 + $0x8] sm:$0xff] %vm1329_vm2, %v1934_v13  ;;  %v1153_v17 = vmul.f32 1.442695, %v1137_v12  ;;  %v865_v58 = vadd.f32 %v2559_v46, %v864_v15 }
 0x28c   : > { %v1031_v18 = vadd.f32 %v2567_v55, %v1030_v16  ;;  %v1125_v62 = vand.u32 2147483647, %v2584_v14  ;;  %v1744_v19 = vpop.f32.mrf.mxu0  ;;  %vm1099_vm5 = vcmp.ne.f32.partialorder %v2584_v14, %v2584_v14 }
 0x28d   : > { %v1815_v0 = vpop.f32.mrf.mxu1  ;;  %1941 = vpow2.f32 %v1153_v17 }
 0x28e   : > { %v2591_v20 = vadd.f32 0.54132485, %v1031_v18  ;;  %v1936_v5 = vpop.eup %1935  ;;  %v1138_v21 = vsub.f32 0.0, %v1125_v62  ;;  %1943 = vtanh.f32 %v865_v58  ;;  %v869_v22 = vpop.f32.mrf.mxu0 }
 0x28f   : > { %v1035_v23 = vpop.f32.mrf.mxu1  ;;  %1332 = vst.msk [vmem:[%s2575_s25 + $0x10] sm:$0xff] %vm1329_vm2, %v1936_v5  ;;  %v870_v25 = vadd.f32 %v2559_v46, %v869_v22 }
 0x290   : > { %v1126_v24 = vand.u32 2147483647, %v2591_v20  ;;  %v1155_v26 = vmul.f32 1.442695, %v1138_v21  ;;  %v1036_v27 = vadd.f32 %v2567_v55, %v1035_v23  ;;  %v1747_v28 = vpop.f32.mrf.mxu0  ;;  %vm1100_vm7 = vcmp.ne.f32.partialorder %v2591_v20, %v2591_v20 }
 0x291   : > { %v1818_v29 = vpop.f32.mrf.mxu1  ;;  %1945 = vtanh.f32 %v870_v25 }
 0x292   : > { %v1139_v30 = vsub.f32 0.0, %v1126_v24  ;;  %v1938_v31 = vpop.eup %1937  ;;  %1947 = vpow2.f32 %v1155_v26  ;;  %v2598_v32 = vadd.f32 0.54132485, %v1036_v27  ;;  %v874_v33 = vpop.f32.mrf.mxu0 }
 0x293   : > { %v1040_v34 = vpop.f32.mrf.mxu1  ;;  %1333 = vst.msk [vmem:[%s2575_s25 + $0x18] sm:$0xff] %vm1329_vm2, %v1938_v31  ;;  %v875_v36 = vadd.f32 %v2559_v46, %v874_v33 }
 0x294   : > { %v1157_v35 = vmul.f32 1.442695, %v1139_v30  ;;  %v1041_v37 = vadd.f32 %v2567_v55, %v1040_v34  ;;  %v1127_v38 = vand.u32 2147483647, %v2598_v32  ;;  %v1750_v39 = vpop.f32.mrf.mxu0  ;;  %v1085_v34 = vmax.f32 %v2577_v2, 0.0 }
 0x295   : > { %v1821_v40 = vpop.f32.mrf.mxu1  ;;  %vm1101_vm10 = vcmp.ne.f32.partialorder %v2598_v32, %v2598_v32 }
 0x296   : > { %1949 = vpow2.f32 %v1157_v35  ;;  %v2605_v41 = vadd.f32 0.54132485, %v1041_v37  ;;  %v1940_v42 = vpop.eup %1939  ;;  %v1140_v43 = vsub.f32 0.0, %v1127_v38  ;;  %v879_v44 = vpop.f32.mrf.mxu0 }
 0x297   : > { %1951 = vtanh.f32 %v875_v36  ;;  %v1045_v45 = vpop.f32.mrf.mxu1  ;;  %1334 = vst.msk [vmem:[%s2575_s25 + $0x20] sm:$0xff] %vm1329_vm2, %v1940_v42  ;;  %v880_v48 = vadd.f32 %v2559_v46, %v879_v44 }
 0x298   : > { %v1128_v47 = vand.u32 2147483647, %v2605_v41  ;;  %v1159_v49 = vmul.f32 1.442695, %v1140_v43  ;;  %v1046_v50 = vadd.f32 %v2567_v55, %v1045_v45  ;;  %v1753_v51 = vpop.f32.mrf.mxu0  ;;  %vm1102_vm12 = vcmp.ne.f32.partialorder %v2605_v41, %v2605_v41 }
 0x299   : > { %v1824_v52 = vpop.f32.mrf.mxu1  ;;  %1953 = vtanh.f32 %v880_v48  ;;  %v1086_v51 = vmax.f32 %v2584_v14, 0.0 }
 0x29a   : > { %v1141_v53 = vsub.f32 0.0, %v1128_v47  ;;  %v2612_v1 = vpop.eup %1941  ;;  %1955 = vpow2.f32 %v1159_v49  ;;  %v2614_v54 = vadd.f32 0.54132485, %v1046_v50  ;;  %v884_v56 = vpop.f32.mrf.mxu0 }
 0x29b   : > { %v1050_v57 = vpop.f32.mrf.mxu1  ;;  %v1944_v59 = vpop.eup %1943  ;;  %v1200_v60 = vadd.f32 1.0, %v2612_v1  ;;  %v885_v3 = vadd.f32 %v2559_v46, %v884_v56  ;;  %v1203_v62 = vmul.f32 -0.5, %v2612_v1  ;;  %v1206_v44 = vand.u32 2147483647, %v2612_v1 }
 0x29c   : > { %v1161_v61 = vmul.f32 1.442695, %v1141_v53  ;;  %1335 = vst.msk [vmem:[%s2575_s25 + $0x28] sm:$0xff] %vm1329_vm2, %v1944_v59  ;;  %v1129_v63 = vand.u32 2147483647, %v2614_v54  ;;  %v1756_v4 = vpop.f32.mrf.mxu0  ;;  %v1051_v7 = vadd.f32 %v2567_v55, %v1050_v57  ;;  %vm1103_vm14 = vcmp.ne.f32.partialorder %v2614_v54, %v2614_v54 }
 0x29d   : > { %v1827_v6 = vpop.f32.mrf.mxu1  ;;  %1957 = vlog2.f32 %v1200_v60  ;;  %v1204_v30 = vadd.f32 1.0, %v1203_v62  ;;  %vm1207_vm4 = vcmp.lt.f32.partialorder %v1206_v44, 0.0004427343 }
 0x29e   : > { %v1946_v8 = vpop.eup %1945  ;;  %1959 = vpow2.f32 %v1161_v61  ;;  %v1142_v9 = vsub.f32 0.0, %v1129_v63  ;;  %v889_v10 = vpop.f32.mrf.mxu0  ;;  %v2626_v13 = vadd.f32 0.54132485, %v1051_v7 }
 0x29f   : > { %v1055_v11 = vpop.f32.mrf.mxu1  ;;  %v2622_v12 = vpop.eup %1947  ;;  %1336 = vst.msk [vmem:[%s2575_s25 + $0x30] sm:$0xff] %vm1329_vm2, %v1946_v8  ;;  %1961 = vtanh.f32 %v885_v3  ;;  %v890_v15 = vadd.f32 %v2559_v46, %v889_v10  ;;  %v1205_v50 = vmul.f32 %v2612_v1, %v1204_v30 }
 0x2a0   : > { %v1209_v16 = vadd.f32 1.0, %v2622_v12  ;;  %v1163_v17 = vmul.f32 1.442695, %v1142_v9  ;;  %v1759_v58 = vpop.f32.mrf.mxu0  ;;  %v1130_v19 = vand.u32 2147483647, %v2626_v13  ;;  %v1056_v5 = vadd.f32 %v2567_v55, %v1055_v11 }
 0x2a1   : > { %v1830_v18 = vpop.f32.mrf.mxu1  ;;  %1963 = vtanh.f32 %v890_v15  ;;  %v1212_v35 = vmul.f32 -0.5, %v2622_v12  ;;  %v1087_v58 = vmax.f32 %v2591_v20, 0.0  ;;  %vm1104_vm0 = vcmp.ne.f32.partialorder %v2626_v13, %v2626_v13 }
 0x2a2   : > { %1965 = vlog2.f32 %v1209_v16  ;;  %v894_v21 = vpop.f32.mrf.mxu0  ;;  %v1143_v25 = vsub.f32 0.0, %v1130_v19  ;;  %v2638_v26 = vadd.f32 0.54132485, %v1056_v5 }
 0x2a3   : > { %v2632_v0 = vpop.eup %1949  ;;  %v1060_v22 = vpop.f32.mrf.mxu1  ;;  %1967 = vpow2.f32 %v1163_v17  ;;  %v895_v27 = vadd.f32 %v2559_v46, %v894_v21  ;;  %v1213_v57 = vadd.f32 1.0, %v1212_v35 }
 0x2a4   : > { %v1952_v23 = vpop.eup %1951  ;;  %v1218_v24 = vadd.f32 1.0, %v2632_v0  ;;  %v1762_v28 = vpop.f32.mrf.mxu0  ;;  %v1061_v31 = vadd.f32 %v2567_v55, %v1060_v22  ;;  %v1165_v36 = vmul.f32 1.442695, %v1143_v25  ;;  %v1131_v37 = vand.u32 2147483647, %v2638_v26 }
 0x2a5   : > { %1337 = vst.msk [vmem:[%s2575_s25 + $0x38] sm:$0xff] %vm1329_vm2, %v1952_v23  ;;  %v1833_v29 = vpop.f32.mrf.mxu1  ;;  %v1221_v45 = vmul.f32 -0.5, %v2632_v0  ;;  %v1214_v19 = vmul.f32 %v2622_v12, %v1213_v57  ;;  %v1224_v5 = vand.u32 2147483647, %v2632_v0 }
 0x2a6   : > { %1969 = vlog2.f32 %v1218_v24  ;;  %v1954_v33 = vpop.eup %1953  ;;  %v899_v38 = vpop.f32.mrf.mxu0  ;;  %v2651_v42 = vadd.f32 0.54132485, %v1061_v31  ;;  %v1144_v52 = vsub.f32 0.0, %v1131_v37 }
 0x2a7   : > { %v1065_v39 = vpop.f32.mrf.mxu1  ;;  %v2645_v40 = vpop.eup %1955  ;;  %1338 = vst.msk [vmem:[%s2575_s25 + $0x40] sm:$0xff] %vm1329_vm2, %v1954_v33  ;;  %1971 = vtanh.f32 %v895_v27  ;;  %v900_v43 = vadd.f32 %v2559_v46, %v899_v38  ;;  %v1215_v46 = vand.u32 2147483647, %v2622_v12  ;;  %v1222_v6 = vadd.f32 1.0, %v1221_v45 }
 0x2a8   : > { %v1227_v47 = vadd.f32 1.0, %v2645_v40  ;;  %1973 = vpow2.f32 %v1165_v36  ;;  %v1765_v48 = vpop.f32.mrf.mxu0  ;;  %v1132_v53 = vand.u32 2147483647, %v2651_v42  ;;  %v1066_v59 = vadd.f32 %v2567_v55, %v1065_v39 }
 0x2a9   : > { %v1836_v49 = vpop.f32.mrf.mxu1  ;;  %v1167_v3 = vmul.f32 1.442695, %v1144_v52  ;;  %vm2671_vm6 = vcmp.lt.f32.partialorder %v1215_v46, 0.0004427343  ;;  %v1230_v24 = vmul.f32 -0.5, %v2645_v40  ;;  %v1223_v29 = vmul.f32 %v2632_v0, %v1222_v6 }
 0x2aa   : > { %v1958_v56 = vpop.eup %1957  ;;  %1975 = vlog2.f32 %v1227_v47  ;;  %v1005_v60 = vpop.f32.mrf.mxu0  ;;  %v1145_v4 = vsub.f32 0.0, %v1132_v53  ;;  %v2669_v11 = vadd.f32 0.54132485, %v1066_v59  ;;  %v1233_v30 = vand.u32 2147483647, %v2645_v40 }
 0x2ab   : > { %v2662_v61 = vpop.eup %1959  ;;  %v1202_v63 = vmul.f32 0.6931472, %v1958_v56  ;;  %1977 = vtanh.f32 %v900_v43  ;;  %v1006_v25 = vadd.f32 %v2567_v55, %v1005_v60  ;;  %vm1225_vm8 = vcmp.lt.f32.partialorder %v1224_v5, 0.0004427343 }
 0x2ac   : > { %v1962_v1 = vpop.eup %1961  ;;  %v1236_v7 = vadd.f32 1.0, %v2662_v61  ;;  %v1800_v8 = vpop.f32.mrf.mxu0  ;;  %1979 = vpow2.f32 %v1167_v3  ;;  %v1169_v10 = vmul.f32 1.442695, %v1145_v4  ;;  %v1133_v21 = vand.u32 2147483647, %v2669_v11 }
 0x2ad   : > { %v1208_v9 = vsel %vm1207_vm4, %v1205_v50, %v1202_v63  ;;  %1339 = vst.msk [vmem:[%s2575_s25 + $0x48] sm:$0xff] %vm1329_vm2, %v1962_v1  ;;  %v1239_v35 = vmul.f32 -0.5, %v2662_v61  ;;  %v2701_v36 = vadd.f32 0.54132485, %v1006_v25  ;;  %v1231_v44 = vadd.f32 1.0, %v1230_v24 }
 0x2ae   : > { %v1964_v15 = vpop.eup %1963  ;;  %v1293_v16 = vadd.f32 %v1208_v9, %v1085_v34  ;;  %1981 = vlog2.f32 %v1236_v7  ;;  %v1010_v18 = vpop.f32.mrf.mxu0  ;;  %vm2714_vm9 = vcmp.lt.f32.partialorder %v1233_v30, 0.0004427343  ;;  %v1242_v57 = vand.u32 2147483647, %v2662_v61 }
 0x2af   : > { %v1966_v62 = vpop.eup %1965  ;;  %1340 = vst.msk [vmem:[%s2575_s25 + $0x50] sm:$0xff] %vm1329_vm2, %v1964_v15  ;;  %1983 = vpow2.f32 %v1169_v10  ;;  %v1011_v0 = vadd.f32 %v2567_v55, %v1010_v18  ;;  %v1121_v52 = vand.u32 2147483647, %v2701_v36  ;;  %v1240_v60 = vadd.f32 1.0, %v1239_v35 }
 0x2b0   : > { %v2681_v22 = vpop.eup %1967  ;;  %v1306_v12 = vsel %vm1098_vm3, %v2577_v2, %v1293_v16  ;;  %v1211_v23 = vmul.f32 0.6931472, %v1966_v62  ;;  %v1803_v27 = vpop.f32.mrf.mxu0  ;;  %v1146_v2 = vsub.f32 0.0, %v1133_v21  ;;  %v1232_v6 = vmul.f32 %v2645_v40, %v1231_v44 }
 0x2b1   : > { %v1319_v28 = vadd.f32 0.1, %v1306_v12  ;;  %v1245_v31 = vadd.f32 1.0, %v2681_v22  ;;  %v2723_v63 = vadd.f32 0.54132485, %v1011_v0  ;;  %v1088_v8 = vmax.f32 %v2598_v32, 0.0 }
 0x2b2   : > { %v1217_v34 = vsel %vm2671_vm6, %v1214_v19, %v1211_v23  ;;  %v1015_v37 = vpop.f32.mrf.mxu0  ;;  %v1171_v45 = vmul.f32 1.442695, %v1146_v2  ;;  %v1248_v9 = vmul.f32 -0.5, %v2681_v22  ;;  %v1089_v16 = vmax.f32 %v2605_v41, 0.0 }
 0x2b3   : > { %v1970_v33 = vpop.eup %1969  ;;  %1346 = vst.msk [vmem:[%s2687_s28 + $0x18] sm:$0xff] %vm1329_vm2, %v1319_v28  ;;  %v1294_v38 = vadd.f32 %v1217_v34, %v1086_v51  ;;  %1985 = vlog2.f32 %v1245_v31  ;;  %v1122_v40 = vand.u32 2147483647, %v2723_v63  ;;  %v1241_v18 = vmul.f32 %v2662_v61, %v1240_v60 }
 0x2b4   : > { %v1220_v39 = vmul.f32 0.6931472, %v1970_v33  ;;  %v1972_v43 = vpop.eup %1971  ;;  %v1806_v47 = vpop.f32.mrf.mxu0  ;;  %1987 = vpow2.f32 %v1171_v45  ;;  %vm1243_vm11 = vcmp.lt.f32.partialorder %v1242_v57, 0.0004427343  ;;  %v1016_v12 = vadd.f32 %v2567_v55, %v1015_v37 }
 0x2b5   : > { %v2708_v48 = vpop.eup %1973  ;;  %v1307_v49 = vsel %vm1099_vm5, %v2584_v14, %v1294_v38  ;;  %1341 = vst.msk [vmem:[%s2575_s25 + $0x58] sm:$0xff] %vm1329_vm2, %v1972_v43  ;;  %v1134_v14 = vsub.f32 0.0, %v1121_v52  ;;  %v1135_v21 = vsub.f32 0.0, %v1122_v40  ;;  %v1249_v24 = vadd.f32 1.0, %v1248_v9 }
 0x2b6   : > { %v1226_v50 = vsel %vm1225_vm8, %v1223_v29, %v1220_v39  ;;  %v1320_v53 = vadd.f32 0.1, %v1307_v49  ;;  %v1254_v46 = vadd.f32 1.0, %v2708_v48  ;;  %v1251_v25 = vand.u32 2147483647, %v2681_v22 }
 0x2b7   : > { %v1295_v56 = vadd.f32 %v1226_v50, %v1087_v58  ;;  %v1976_v59 = vpop.eup %1975  ;;  %v1147_v10 = vmul.f32 1.442695, %v1134_v14  ;;  %v1257_v61 = vmul.f32 -0.5, %v2708_v48  ;;  %v1149_v31 = vmul.f32 1.442695, %v1135_v21 }
 0x2b8   : > { %v1978_v3 = vpop.eup %1977  ;;  %1347 = vst.msk [vmem:[%s2687_s28 + $0x20] sm:$0xff] %vm1329_vm2, %v1320_v53  ;;  %v1229_v1 = vmul.f32 0.6931472, %v1976_v59  ;;  %1989 = vlog2.f32 %v1254_v46  ;;  %v2759_v55 = vadd.f32 0.54132485, %v1016_v12  ;;  %v1250_v35 = vmul.f32 %v2681_v22, %v1249_v24 }
 0x2b9   : > { %v1308_v4 = vsel %vm1100_vm7, %v2591_v20, %v1295_v56  ;;  %1342 = vst.msk [vmem:[%s2575_s25 + $0x60] sm:$0xff] %vm1329_vm2, %v1978_v3  ;;  %v2736_v15 = vpop.eup %1979  ;;  %1991 = vpow2.f32 %v1147_v10  ;;  %v1090_v37 = vmax.f32 %v2614_v54, 0.0  ;;  %vm1252_vm13 = vcmp.lt.f32.partialorder %v1251_v25, 0.0004427343 }
 0x2ba   : > { %v1321_v7 = vadd.f32 0.1, %v1308_v4  ;;  %v1235_v20 = vsel %vm2714_vm9, %v1232_v6, %v1229_v1  ;;  %v1263_v62 = vadd.f32 1.0, %v2736_v15  ;;  %v1258_v38 = vadd.f32 1.0, %v1257_v61 }
 0x2bb   : > { %v1982_v17 = vpop.eup %1981  ;;  %v1296_v58 = vadd.f32 %v1235_v20, %v1088_v8  ;;  %v1260_v0 = vand.u32 2147483647, %v2708_v48  ;;  %v1266_v43 = vmul.f32 -0.5, %v2736_v15  ;;  %v1123_v44 = vand.u32 2147483647, %v2759_v55 }
 0x2bc   : > { %1348 = vst.msk [vmem:[%s2687_s28 + $0x28] sm:$0xff] %vm1329_vm2, %v1321_v7  ;;  %v2748_v19 = vpop.eup %1983  ;;  %v1238_v5 = vmul.f32 0.6931472, %v1982_v17  ;;  %1993 = vlog2.f32 %v1263_v62  ;;  %v1091_v22 = vmax.f32 %v2626_v13, 0.0  ;;  %v1259_v53 = vmul.f32 %v2708_v48, %v1258_v38 }
 0x2bd   : > { %v1309_v23 = vsel %vm1101_vm10, %v2598_v32, %v1296_v58  ;;  %v1272_v29 = vadd.f32 1.0, %v2748_v19  ;;  %v1136_v50 = vsub.f32 0.0, %v1123_v44  ;;  %v1275_v56 = vmul.f32 -0.5, %v2748_v19 }
 0x2be   : > { %v1322_v27 = vadd.f32 0.1, %v1309_v23  ;;  %v1244_v28 = vsel %vm1243_vm11, %v1241_v18, %v1238_v5  ;;  %vm1261_vm15 = vcmp.lt.f32.partialorder %v1260_v0, 0.0004427343  ;;  %v1267_v46 = vadd.f32 1.0, %v1266_v43 }
 0x2bf   : > { %v1297_v30 = vadd.f32 %v1244_v28, %v1089_v16  ;;  %1995 = vlog2.f32 %v1272_v29  ;;  %v1269_v60 = vand.u32 2147483647, %v2736_v15  ;;  %v1151_v14 = vmul.f32 1.442695, %v1136_v50 }
 0x2c0   : > { %v1986_v33 = vpop.eup %1985  ;;  %1349 = vst.msk [vmem:[%s2687_s28 + $0x30] sm:$0xff] %vm1329_vm2, %v1322_v27  ;;  %1997 = vpow2.f32 %v1149_v31  ;;  %v1268_v8 = vmul.f32 %v2736_v15, %v1267_v46  ;;  %v1278_v9 = vand.u32 2147483647, %v2748_v19  ;;  %v1092_v20 = vmax.f32 %v2638_v26, 0.0 }
 0x2c1   : > { %v1310_v32 = vsel %vm1102_vm12, %v2605_v41, %v1297_v30  ;;  %v1247_v34 = vmul.f32 0.6931472, %v1986_v33  ;;  %v2767_v45 = vpop.eup %1987  ;;  %vm1270_vm1 = vcmp.lt.f32.partialorder %v1269_v60, 0.0004427343  ;;  %vm1105_vm3 = vcmp.ne.f32.partialorder %v2638_v26, %v2638_v26 }
 0x2c2   : > { %v1323_v2 = vadd.f32 0.1, %v1310_v32  ;;  %v1281_v49 = vadd.f32 1.0, %v2767_v45  ;;  %v1284_v17 = vmul.f32 -0.5, %v2767_v45  ;;  %v1093_v15 = vmax.f32 %v2651_v42, 0.0 }
 0x2c3   : > { %v1253_v39 = vsel %vm1252_vm13, %v1250_v35, %v1247_v34  ;;  %vm1279_vm4 = vcmp.lt.f32.partialorder %v1278_v9, 0.0004427343  ;;  %vm1106_vm5 = vcmp.ne.f32.partialorder %v2651_v42, %v2651_v42  ;;  %v1094_v31 = vmax.f32 %v2669_v11, 0.0 }
 0x2c4   : > { %1350 = vst.msk [vmem:[%s2687_s28 + $0x38] sm:$0xff] %vm1329_vm2, %v1323_v2  ;;  %v1298_v41 = vadd.f32 %v1253_v39, %v1090_v37  ;;  %1999 = vlog2.f32 %v1281_v49  ;;  %v1285_v25 = vadd.f32 1.0, %v1284_v17  ;;  %vm1107_vm7 = vcmp.ne.f32.partialorder %v2669_v11, %v2669_v11 }
 0x2c5   : > { %v1990_v47 = vpop.eup %1989  ;;  %2001 = vpow2.f32 %v1151_v14  ;;  %vm1095_vm9 = vcmp.ne.f32.partialorder %v2701_v36, %v2701_v36  ;;  %vm1096_vm11 = vcmp.ne.f32.partialorder %v2723_v63, %v2723_v63  ;;  %vm1097_vm13 = vcmp.ne.f32.partialorder %v2759_v55, %v2759_v55 }
 0x2c6   : > { %v1311_v51 = vsel %vm1103_vm14, %v2614_v54, %v1298_v41  ;;  %v1256_v52 = vmul.f32 0.6931472, %v1990_v47  ;;  %v1992_v3 = vpop.eup %1991  ;;  %v1276_v54 = vadd.f32 1.0, %v1275_v56  ;;  %v1083_v56 = vmax.f32 %v2723_v63, 0.0 }
 0x2c7   : > { %v1324_v57 = vadd.f32 0.1, %v1311_v51  ;;  %v1173_v48 = vadd.f32 1.0, %v1992_v3  ;;  %v1176_v27 = vmul.f32 -0.5, %v1992_v3  ;;  %v1179_v35 = vand.u32 2147483647, %v1992_v3 }
 0x2c8   : > { %v1262_v59 = vsel %vm1261_vm15, %v1259_v53, %v1256_v52  ;;  %v1277_v62 = vmul.f32 %v2748_v19, %v1276_v54  ;;  %v1287_v19 = vand.u32 2147483647, %v2767_v45 }
 0x2c9   : > { %1351 = vst.msk [vmem:[%s2687_s28 + $0x40] sm:$0xff] %vm1329_vm2, %v1324_v57  ;;  %v1299_v4 = vadd.f32 %v1262_v59, %v1091_v22  ;;  %v1994_v1 = vpop.eup %1993  ;;  %2003 = vlog2.f32 %v1173_v48  ;;  %v1177_v33 = vadd.f32 1.0, %v1176_v27  ;;  %vm1180_vm8 = vcmp.lt.f32.partialorder %v1179_v35, 0.0004427343 }
 0x2ca   : > { %v1265_v7 = vmul.f32 0.6931472, %v1994_v1  ;;  %vm1288_vm6 = vcmp.lt.f32.partialorder %v1287_v19, 0.0004427343  ;;  %v1084_v48 = vmax.f32 %v2759_v55, 0.0 }
 0x2cb   : > { %v1312_v6 = vsel %vm1104_vm0, %v2626_v13, %v1299_v4  ;;  %v1178_v43 = vmul.f32 %v1992_v3, %v1177_v33 }
 0x2cc   : > { %v1325_v10 = vadd.f32 0.1, %v1312_v6  ;;  %v1996_v16 = vpop.eup %1995  ;;  %v1271_v40 = vsel %vm1270_vm1, %v1268_v8, %v1265_v7 }
 0x2cd   : > { %v1998_v58 = vpop.eup %1997  ;;  %v1300_v18 = vadd.f32 %v1271_v40, %v1092_v20  ;;  %v1274_v13 = vmul.f32 0.6931472, %v1996_v16 }
 0x2ce   : > { %1352 = vst.msk [vmem:[%s2687_s28 + $0x48] sm:$0xff] %vm1329_vm2, %v1325_v10  ;;  %v1182_v5 = vadd.f32 1.0, %v1998_v58  ;;  %v1185_v2 = vmul.f32 -0.5, %v1998_v58  ;;  %v1188_v22 = vand.u32 2147483647, %v1998_v58 }
 0x2cf   : > { %v1313_v21 = vsel %vm1105_vm3, %v2638_v26, %v1300_v18  ;;  %v1280_v12 = vsel %vm1279_vm4, %v1277_v62, %v1274_v13  ;;  %v1286_v26 = vmul.f32 %v2767_v45, %v1285_v25  ;;  %v1082_v45 = vmax.f32 %v2701_v36, 0.0 }
 0x2d0   : > { %v1326_v23 = vadd.f32 0.1, %v1313_v21  ;;  %v1301_v24 = vadd.f32 %v1280_v12, %v1093_v15  ;;  %2005 = vlog2.f32 %v1182_v5  ;;  %v1186_v41 = vadd.f32 1.0, %v1185_v2 }
 0x2d1   : > { %v2000_v61 = vpop.eup %1999  ;;  %vm1189_vm10 = vcmp.lt.f32.partialorder %v1188_v22, 0.0004427343 }
 0x2d2   : > { %1353 = vst.msk [vmem:[%s2687_s28 + $0x50] sm:$0xff] %vm1329_vm2, %v1326_v23  ;;  %v1314_v28 = vsel %vm1106_vm5, %v2651_v42, %v1301_v24  ;;  %v1283_v30 = vmul.f32 0.6931472, %v2000_v61  ;;  %v2002_v32 = vpop.eup %2001  ;;  %v1187_v52 = vmul.f32 %v1998_v58, %v1186_v41 }
 0x2d3   : > { %v1327_v29 = vadd.f32 0.1, %v1314_v28  ;;  %v1191_v38 = vadd.f32 1.0, %v2002_v32  ;;  %v1194_v57 = vmul.f32 -0.5, %v2002_v32  ;;  %v1197_v3 = vand.u32 2147483647, %v2002_v32 }
 0x2d4   : > { %v1289_v34 = vsel %vm1288_vm6, %v1286_v26, %v1283_v30 }
 0x2d5   : > { %1354 = vst.msk [vmem:[%s2687_s28 + $0x58] sm:$0xff] %vm1329_vm2, %v1327_v29  ;;  %v1302_v37 = vadd.f32 %v1289_v34, %v1094_v31  ;;  %2007 = vlog2.f32 %v1191_v38  ;;  %v1195_v14 = vadd.f32 1.0, %v1194_v57  ;;  %vm1198_vm12 = vcmp.lt.f32.partialorder %v1197_v3, 0.0004427343 }
 0x2d6   : > { %v2004_v39 = vpop.eup %2003 }
 0x2d7   : > { %v1315_v42 = vsel %vm1107_vm7, %v2669_v11, %v1302_v37  ;;  %v1175_v0 = vmul.f32 0.6931472, %v2004_v39  ;;  %v1196_v54 = vmul.f32 %v2002_v32, %v1195_v14 }
 0x2d8   : > { %v1328_v44 = vadd.f32 0.1, %v1315_v42 }
 0x2d9   : > { %v1181_v47 = vsel %vm1180_vm8, %v1178_v43, %v1175_v0 }
 0x2da   : > { %1355 = vst.msk [vmem:[%s2687_s28 + $0x60] sm:$0xff] %vm1329_vm2, %v1328_v44  ;;  %v1290_v49 = vadd.f32 %v1181_v47, %v1082_v45 }
 0x2dc   : > { %v1303_v11 = vsel %vm1095_vm9, %v2701_v36, %v1290_v49 }
 0x2dd   : > { %v2006_v50 = vpop.eup %2005  ;;  %v1316_v53 = vadd.f32 0.1, %v1303_v11 }
 0x2de   : > { %v1184_v51 = vmul.f32 0.6931472, %v2006_v50 }
 0x2df   : > { %1343 = vst.msk [vmem:[%s2687_s28] sm:$0xff] %vm1329_vm2, %v1316_v53 }
 0x2e0   : > { %v1190_v46 = vsel %vm1189_vm10, %v1187_v52, %v1184_v51 }
 0x2e1   : > { %v1291_v59 = vadd.f32 %v1190_v46, %v1083_v56 }
 0x2e2   : > { %v2008_v4 = vpop.eup %2007 }
 0x2e3   : > { %v1304_v60 = vsel %vm1096_vm11, %v2723_v63, %v1291_v59  ;;  %v1193_v1 = vmul.f32 0.6931472, %v2008_v4 }
 0x2e4   : > { %v1317_v36 = vadd.f32 0.1, %v1304_v60 }
 0x2e5   : > { %v1199_v6 = vsel %vm1198_vm12, %v1196_v54, %v1193_v1 }
 0x2e6   : > { %1344 = vst.msk [vmem:[%s2687_s28 + $0x8] sm:$0xff] %vm1329_vm2, %v1317_v36  ;;  %v1292_v7 = vadd.f32 %v1199_v6, %v1084_v48 }
 0x2e8   : > { %v1305_v8 = vsel %vm1097_vm13, %v2759_v55, %v1292_v7 }
 0x2e9   : > { %v1318_v9 = vadd.f32 0.1, %v1305_v8 }
 0x2eb   : > { %1345 = vst.msk [vmem:[%s2687_s28 + $0x10] sm:$0xff] %vm1329_vm2, %v1318_v9 }
 0x2ec PF: > { %s21_s13 = sadd.s32 1, %s2015_s13  }
 0x2ed   : > { %p18_p4 = scmp.ge.s32.totalorder %s21_s13, 4  }
 0x2ef   :  { %20 = sbr.rel (!%p18_p4) target bundleno = 1 (0x1), region = 98 }

</bundles_post_ra>
